<compile_context>
chip_gen: v5e
topology: v5e:2x2
jax: 0.10.0
libtpu: 0.0.40
codegen_flags: <defaults>
</compile_context>

<pallas_src>
import functools

import jax
import jax.numpy as jnp
from jax import lax
from jax.experimental import pallas as pl
from jax.experimental.pallas import tpu as pltpu


# ----------------------------------------------------------------------------
# helpers
# ----------------------------------------------------------------------------
def _round_up(n, m):
    return ((n + m - 1) // m) * m


def _pad2(a, rows, cols, value=0.0):
    r, c = a.shape
    return jnp.pad(a, ((0, rows - r), (0, cols - c)), constant_values=value)


# ----------------------------------------------------------------------------
# fused kernel: backbone (K-tiled matmul) + instance/cluster heads
# ----------------------------------------------------------------------------
def _make_kernel(compute_z: bool):
    def kernel(x_ref, wb_ref, bb_ref, w1_ref, b1_ref, w2_ref, b2_ref,
               w3_ref, b3_ref, *rest):
        if compute_z:
            z_ref, c_ref, acc_ref = rest
        else:
            c_ref, acc_ref = rest

        k = pl.program_id(1)

        @pl.when(k == 0)
        def _init():
            acc_ref[...] = jnp.zeros_like(acc_ref)

        # backbone stand-in matmul, accumulated over the K grid axis (f32 acc).
        acc_ref[...] += jnp.dot(x_ref[...], wb_ref[...],
                                preferred_element_type=jnp.float32)

        @pl.when(k == pl.num_programs(1) - 1)
        def _finalize():
            # bias + ReLU only once, in the finalize branch.
            h = jnp.maximum(acc_ref[...] + bb_ref[...], 0.0)

            # instance_projector: Linear -> ReLU -> Linear (bf16 MXU, f32 acc)
            t = jnp.dot(h.astype(jnp.bfloat16), w1_ref[...],
                        preferred_element_type=jnp.float32) + b1_ref[...]
            t = jnp.maximum(t, 0.0)
            inst = jnp.dot(t.astype(jnp.bfloat16), w2_ref[...],
                           preferred_element_type=jnp.float32) + b2_ref[...]

            if compute_z:
                # z = F.normalize(inst, dim=1); clamp ||.||^2 at 1e-24 == torch
                # clamping ||.|| at 1e-12.  rsqrt runs on the EUP slot.
                sq = jnp.sum(inst * inst, axis=1, keepdims=True)
                z_ref[...] = inst * lax.rsqrt(jnp.maximum(sq, 1e-24))

            # cluster_projector: ReLU -> Linear -> Softmax(dim=1)
            logits = jnp.dot(jnp.maximum(inst, 0.0).astype(jnp.bfloat16),
                             w3_ref[...],
                             preferred_element_type=jnp.float32) + b3_ref[...]
            m = jnp.max(logits, axis=1, keepdims=True)
            e = jnp.exp(logits - m)
            c_ref[...] = e * pl.reciprocal(jnp.sum(e, axis=1, keepdims=True),
                                           approx=True)

    return kernel


# ----------------------------------------------------------------------------
# Network_cluster in JAX/Pallas
# ----------------------------------------------------------------------------
class NetworkClusterPallas:
    # TODO(synk): `resnet` is an external backbone passed into __init__ in the
    # PyTorch spec; stand-in here is flatten(NCHW) -> Linear -> ReLU producing
    # rep_dim features (tiled over the contraction axis like a real backbone
    # matmul would be).
    def __init__(self, key, in_dim, rep_dim, feature_dim, class_num):
        self.in_dim = in_dim
        self.rep_dim = rep_dim
        self.feature_dim = feature_dim
        self.class_num = class_num

        # padded (lane-dense) dims
        self.R = _round_up(rep_dim, 128)
        self.F = _round_up(feature_dim, 128)
        self.C = _round_up(class_num, 128)
        self.Kp = _round_up(in_dim, 128)
        self.TK = 512 if self.Kp >= 512 else self.Kp
        self.Kp = _round_up(self.Kp, self.TK)

        ks = jax.random.split(key, 8)
        s = 0.05

        def rnd(k, shape):
            return jax.random.normal(k, shape, jnp.float32) * s

        wb = rnd(ks[0], (in_dim, rep_dim))
        bb = rnd(ks[1], (1, rep_dim))
        w1 = rnd(ks[2], (rep_dim, rep_dim))
        b1 = rnd(ks[3], (1, rep_dim))
        w2 = rnd(ks[4], (rep_dim, feature_dim))
        b2 = rnd(ks[5], (1, feature_dim))
        w3 = rnd(ks[6], (feature_dim, class_num))
        b3 = rnd(ks[7], (1, class_num))

        # unpadded f32 copies (used only by the pure-JAX reference check)
        self.ref = dict(wb=wb, bb=bb, w1=w1, b1=b1, w2=w2, b2=b2, w3=w3, b3=b3)

        # padded params: weights in bf16 (MXU operands), biases in f32.
        self.wb = _pad2(wb, self.Kp, self.R).astype(jnp.bfloat16)
        self.bb = _pad2(bb, 1, self.R)
        self.w1 = _pad2(w1, self.R, self.R).astype(jnp.bfloat16)
        self.b1 = _pad2(b1, 1, self.R)
        self.w2 = _pad2(w2, self.R, self.F).astype(jnp.bfloat16)
        self.b2 = _pad2(b2, 1, self.F)
        self.w3 = _pad2(w3, self.F, self.C).astype(jnp.bfloat16)
        # padded class columns get a huge negative bias -> softmax mass ~0
        self.b3 = jnp.full((1, self.C), -1e9, jnp.float32).at[:, :class_num].set(b3)

    # ------------------------------------------------------------------ utils
    def _prep_input(self, x2d):
        """Pad (N, in_dim) to (N_pad, Kp), cast to bf16, pick batch tile."""
        n, k = x2d.shape
        n_pad = _round_up(max(n, 8), 8)
        tb = 256 if n_pad >= 256 else n_pad
        n_pad = _round_up(n_pad, tb)
        xp = jnp.zeros((n_pad, self.Kp), jnp.bfloat16)
        xp = xp.at[:n, :k].set(x2d.astype(jnp.bfloat16))
        return xp, tb

    def _run(self, xp, tb, compute_z):
        Bp = xp.shape[0]
        R, F, C, tk = self.R, self.F, self.C, self.TK
        grid = (Bp // tb, self.Kp // tk)

        in_specs = [
            pl.BlockSpec((tb, tk), lambda i, k: (i, k)),   # x
            pl.BlockSpec((tk, R), lambda i, k: (k, 0)),    # wb
            pl.BlockSpec((1, R), lambda i, k: (0, 0)),     # bb
            pl.BlockSpec((R, R), lambda i, k: (0, 0)),     # w1
            pl.BlockSpec((1, R), lambda i, k: (0, 0)),     # b1
            pl.BlockSpec((R, F), lambda i, k: (0, 0)),     # w2
            pl.BlockSpec((1, F), lambda i, k: (0, 0)),     # b2
            pl.BlockSpec((F, C), lambda i, k: (0, 0)),     # w3
            pl.BlockSpec((1, C), lambda i, k: (0, 0)),     # b3
        ]
        if compute_z:
            out_shape = (jax.ShapeDtypeStruct((Bp, F), jnp.float32),
                         jax.ShapeDtypeStruct((Bp, C), jnp.float32))
            out_specs = (pl.BlockSpec((tb, F), lambda i, k: (i, 0)),
                         pl.BlockSpec((tb, C), lambda i, k: (i, 0)))
        else:
            out_shape = jax.ShapeDtypeStruct((Bp, C), jnp.float32)
            out_specs = pl.BlockSpec((tb, C), lambda i, k: (i, 0))

        return pl.pallas_call(
            _make_kernel(compute_z),
            out_shape=out_shape,
            grid=grid,
            in_specs=in_specs,
            out_specs=out_specs,
            scratch_shapes=[pltpu.VMEM((tb, R), jnp.float32)],
            compiler_params=pltpu.CompilerParams(
                dimension_semantics=("parallel", "arbitrary"),
                vmem_limit_bytes=32 * 1024 * 1024,
            ),
        )(xp, self.wb, self.bb, self.w1, self.b1, self.w2, self.b2,
          self.w3, self.b3)

    # --------------------------------------------------------------- forward
    def forward(self, x_i, x_j):
        B = x_i.shape[0]
        # batch the two views so head weights are DMA'd once and one kernel runs
        x = jnp.concatenate(
            [x_i.reshape(B, -1), x_j.reshape(B, -1)], axis=0).astype(jnp.float32)
        xp, tb = self._prep_input(x)
        z, c = self._run(xp, tb, compute_z=True)
        z_i = z[:B, :self.feature_dim]
        z_j = z[B:2 * B, :self.feature_dim]
        c_i = c[:B, :self.class_num]
        c_j = c[B:2 * B, :self.class_num]
        return z_i, z_j, c_i, c_j

    def forward_cluster(self, x):
        B = x.shape[0]
        xp, tb = self._prep_input(x.reshape(B, -1).astype(jnp.float32))
        c = self._run(xp, tb, compute_z=False)   # variant kernel: skip z / normalize
        return jnp.argmax(c[:B, :self.class_num], axis=1)


# ----------------------------------------------------------------------------
# pure-JAX reference (f32) for correctness checking
# ----------------------------------------------------------------------------
def _reference_forward(ref, x_i, x_j):
    def backbone(x):
        b = x.shape[0]
        return jnp.maximum(x.reshape(b, -1) @ ref["wb"] + ref["bb"], 0.0)

    def heads(h):
        t = jnp.maximum(h @ ref["w1"] + ref["b1"], 0.0)
        inst = t @ ref["w2"] + ref["b2"]
        nrm = jnp.maximum(jnp.linalg.norm(inst, axis=1, keepdims=True), 1e-12)
        z = inst / nrm
        logits = jnp.maximum(inst, 0.0) @ ref["w3"] + ref["b3"]
        return z, jax.nn.softmax(logits, axis=1)

    z_i, c_i = heads(backbone(x_i.astype(jnp.float32)))
    z_j, c_j = heads(backbone(x_j.astype(jnp.float32)))
    return z_i, z_j, c_i, c_j


# ----------------------------------------------------------------------------
if __name__ == "__main__":
    B, C, H, W = 2, 4, 16, 16
    rep_dim, feature_dim, class_num = 32, 16, 8
    in_dim = C * H * W

    key = jax.random.PRNGKey(0)
    k_net, k_xi, k_xj = jax.random.split(key, 3)

    net = NetworkClusterPallas(k_net, in_dim, rep_dim, feature_dim, class_num)

    x_i = jax.random.normal(k_xi, (B, C, H, W), jnp.float32)  # NCHW, like PyTorch
    x_j = jax.random.normal(k_xj, (B, C, H, W), jnp.float32)

    z_i, z_j, c_i, c_j = net.forward(x_i, x_j)
    jax.block_until_ready((z_i, z_j, c_i, c_j))

    # shapes
    assert z_i.shape == (B, feature_dim) and z_j.shape == (B, feature_dim)
    assert c_i.shape == (B, class_num) and c_j.shape == (B, class_num)

    # structural numerics: z rows unit-norm, c rows sum to 1
    assert jnp.allclose(jnp.linalg.norm(z_i, axis=1), 1.0, atol=1e-3)
    assert jnp.allclose(jnp.linalg.norm(z_j, axis=1), 1.0, atol=1e-3)
    assert jnp.allclose(jnp.sum(c_i, axis=1), 1.0, atol=1e-2)
    assert jnp.allclose(jnp.sum(c_j, axis=1), 1.0, atol=1e-2)

    # match the f32 pure-JAX reference (loose tol: bf16 MXU operands)
    rz_i, rz_j, rc_i, rc_j = _reference_forward(net.ref, x_i, x_j)
    assert jnp.allclose(z_i, rz_i, atol=5e-2)
    assert jnp.allclose(z_j, rz_j, atol=5e-2)
    assert jnp.allclose(c_i, rc_i, atol=5e-2)
    assert jnp.allclose(c_j, rc_j, atol=5e-2)

    labels = net.forward_cluster(x_i)
    jax.block_until_ready(labels)
    assert labels.shape == (B,)

    print("KERNEL_OK")
</pallas_src>

<mosaic_0001>
module attributes {stable_mosaic.version = 11 : i64} {
  func.func @kernel(%arg0: i32, %arg1: i32, %arg2: memref<8x512xbf16, #tpu.memory_space<vmem>>, %arg3: memref<512x128xbf16, #tpu.memory_space<vmem>>, %arg4: memref<1x128xf32, #tpu.memory_space<vmem>>, %arg5: memref<128x128xbf16, #tpu.memory_space<vmem>>, %arg6: memref<1x128xf32, #tpu.memory_space<vmem>>, %arg7: memref<128x128xbf16, #tpu.memory_space<vmem>>, %arg8: memref<1x128xf32, #tpu.memory_space<vmem>>, %arg9: memref<128x128xbf16, #tpu.memory_space<vmem>>, %arg10: memref<1x128xf32, #tpu.memory_space<vmem>>, %arg11: memref<8x128xf32, #tpu.memory_space<vmem>>, %arg12: memref<8x128xf32, #tpu.memory_space<vmem>>, %arg13: memref<8x128xf32, #tpu.memory_space<vmem>>) attributes {dimension_semantics = [#tpu.dimension_semantics<parallel>, #tpu.dimension_semantics<arbitrary>], iteration_bounds = array<i64: 1, 2>, scalar_prefetch = 0 : i64, scratch_operands = 1 : i64, tpu.core_type = #tpu.core_type<tc>, window_params = [{transform_indices = @transform_0, window_bounds = array<i64: 8, 512>}, {transform_indices = @transform_1, window_bounds = array<i64: 512, 128>}, {pipeline_mode = #tpu.pipeline_mode<synchronous>, transform_indices = @transform_2, window_bounds = array<i64: 1, 128>}, {pipeline_mode = #tpu.pipeline_mode<synchronous>, transform_indices = @transform_3, window_bounds = array<i64: 128, 128>}, {pipeline_mode = #tpu.pipeline_mode<synchronous>, transform_indices = @transform_4, window_bounds = array<i64: 1, 128>}, {pipeline_mode = #tpu.pipeline_mode<synchronous>, transform_indices = @transform_5, window_bounds = array<i64: 128, 128>}, {pipeline_mode = #tpu.pipeline_mode<synchronous>, transform_indices = @transform_6, window_bounds = array<i64: 1, 128>}, {pipeline_mode = #tpu.pipeline_mode<synchronous>, transform_indices = @transform_7, window_bounds = array<i64: 128, 128>}, {pipeline_mode = #tpu.pipeline_mode<synchronous>, transform_indices = @transform_8, window_bounds = array<i64: 1, 128>}, {transform_indices = @transform_9, window_bounds = array<i64: 8, 128>}, {transform_indices = @transform_10, window_bounds = array<i64: 8, 128>}]} {
    %c0_i32 = arith.constant 0 : i32
    %0 = arith.cmpi eq, %arg1, %c0_i32 : i32
    %1 = arith.extui %0 : i1 to i32
    %c0_i32_0 = arith.constant 0 : i32
    %2 = arith.cmpi ne, %1, %c0_i32_0 : i32
    scf.if %2 {
      %cst_9 = arith.constant 0.000000e+00 : f32
      %12 = vector.broadcast %cst_9 : f32 to vector<8x128xf32>
      %c0_10 = arith.constant 0 : index
      %c0_11 = arith.constant 0 : index
      %13 = vector.load %arg13[%c0_10, %c0_11] : memref<8x128xf32, #tpu.memory_space<vmem>>, vector<8x128xf32>
      tpu.vector_store %arg13[%c0_10, %c0_11], %12 {strides = array<i32>} : memref<8x128xf32, #tpu.memory_space<vmem>>, vector<8x128xf32>,
    } else {
    }
    %c0 = arith.constant 0 : index
    %c0_1 = arith.constant 0 : index
    %3 = vector.load %arg13[%c0, %c0_1] : memref<8x128xf32, #tpu.memory_space<vmem>>, vector<8x128xf32>
    %c0_2 = arith.constant 0 : index
    %c0_3 = arith.constant 0 : index
    %4 = vector.load %arg2[%c0_2, %c0_3] : memref<8x512xbf16, #tpu.memory_space<vmem>>, vector<8x512xbf16>
    %c0_4 = arith.constant 0 : index
    %c0_5 = arith.constant 0 : index
    %5 = vector.load %arg3[%c0_4, %c0_5] : memref<512x128xbf16, #tpu.memory_space<vmem>>, vector<512x128xbf16>
    %cst = arith.constant dense<0.000000e+00> : vector<8x128xf32>
    %6 = tpu.matmul %4, %5, %cst {dimension_numbers = #tpu.dot_dimension_numbers<[1], [0], [0], [1], [0, 0, 1, 1], [], []>} : vector<8x512xbf16>, vector<512x128xbf16>, vector<8x128xf32> -> vector<8x128xf32>
    %7 = arith.addf %3, %6 : vector<8x128xf32>
    %c0_6 = arith.constant 0 : index
    %c0_7 = arith.constant 0 : index
    %8 = vector.load %arg13[%c0_6, %c0_7] : memref<8x128xf32, #tpu.memory_space<vmem>>, vector<8x128xf32>
    tpu.vector_store %arg13[%c0_6, %c0_7], %7 {strides = array<i32>} : memref<8x128xf32, #tpu.memory_space<vmem>>, vector<8x128xf32>,
    %c1_i32 = arith.constant 1 : i32
    %9 = arith.cmpi eq, %arg1, %c1_i32 : i32
    %10 = arith.extui %9 : i1 to i32
    %c0_i32_8 = arith.constant 0 : i32
    %11 = arith.cmpi ne, %10, %c0_i32_8 : i32
    scf.if %11 {
      %c0_9 = arith.constant 0 : index
      %c0_10 = arith.constant 0 : index
      %12 = vector.load %arg13[%c0_9, %c0_10] : memref<8x128xf32, #tpu.memory_space<vmem>>, vector<8x128xf32>
      %c0_11 = arith.constant 0 : index
      %c0_12 = arith.constant 0 : index
      %13 = vector.load %arg4[%c0_11, %c0_12] : memref<1x128xf32, #tpu.memory_space<vmem>>, vector<1x128xf32>
      %14 = vector.broadcast %13 : vector<1x128xf32> to vector<8x128xf32>
      %15 = arith.addf %12, %14 : vector<8x128xf32>
      %cst_13 = arith.constant 0.000000e+00 : f32
      %16 = vector.broadcast %cst_13 : f32 to vector<8x128xf32>
      %17 = arith.maximumf %15, %16 : vector<8x128xf32>
      %18 = arith.truncf %17 : vector<8x128xf32> to vector<8x128xbf16>
      %c0_14 = arith.constant 0 : index
      %c0_15 = arith.constant 0 : index
      %19 = vector.load %arg5[%c0_14, %c0_15] : memref<128x128xbf16, #tpu.memory_space<vmem>>, vector<128x128xbf16>
      %cst_16 = arith.constant dense<0.000000e+00> : vector<8x128xf32>
      %20 = tpu.matmul %18, %19, %cst_16 {dimension_numbers = #tpu.dot_dimension_numbers<[1], [0], [0], [1], [0, 0, 1, 1], [], []>} : vector<8x128xbf16>, vector<128x128xbf16>, vector<8x128xf32> -> vector<8x128xf32>
      %c0_17 = arith.constant 0 : index
      %c0_18 = arith.constant 0 : index
      %21 = vector.load %arg6[%c0_17, %c0_18] : memref<1x128xf32, #tpu.memory_space<vmem>>, vector<1x128xf32>
      %22 = vector.broadcast %21 : vector<1x128xf32> to vector<8x128xf32>
      %23 = arith.addf %20, %22 : vector<8x128xf32>
      %cst_19 = arith.constant 0.000000e+00 : f32
      %24 = vector.broadcast %cst_19 : f32 to vector<8x128xf32>
      %25 = arith.maximumf %23, %24 : vector<8x128xf32>
      %26 = arith.truncf %25 : vector<8x128xf32> to vector<8x128xbf16>
      %c0_20 = arith.constant 0 : index
      %c0_21 = arith.constant 0 : index
      %27 = vector.load %arg7[%c0_20, %c0_21] : memref<128x128xbf16, #tpu.memory_space<vmem>>, vector<128x128xbf16>
      %cst_22 = arith.constant dense<0.000000e+00> : vector<8x128xf32>
      %28 = tpu.matmul %26, %27, %cst_22 {dimension_numbers = #tpu.dot_dimension_numbers<[1], [0], [0], [1], [0, 0, 1, 1], [], []>} : vector<8x128xbf16>, vector<128x128xbf16>, vector<8x128xf32> -> vector<8x128xf32>
      %c0_23 = arith.constant 0 : index
      %c0_24 = arith.constant 0 : index
      %29 = vector.load %arg8[%c0_23, %c0_24] : memref<1x128xf32, #tpu.memory_space<vmem>>, vector<1x128xf32>
      %30 = vector.broadcast %29 : vector<1x128xf32> to vector<8x128xf32>
      %31 = arith.addf %28, %30 : vector<8x128xf32>
      %32 = arith.mulf %31, %31 : vector<8x128xf32>
      %cst_25 = arith.constant dense<0.000000e+00> : vector<8xf32>
      %33 = vector.multi_reduction <add>, %32, %cst_25 [1] : vector<8x128xf32> to vector<8xf32>
      %34 = vector.shape_cast %33 : vector<8xf32> to vector<8x1xf32>
      %cst_26 = arith.constant 1.000000e-24 : f32
      %35 = vector.broadcast %cst_26 : f32 to vector<8x1xf32>
      %36 = arith.maximumf %34, %35 : vector<8x1xf32>
      %37 = math.rsqrt %36 : vector<8x1xf32>
      %38 = vector.broadcast %37 : vector<8x1xf32> to vector<8x128xf32>
      %39 = arith.mulf %31, %38 : vector<8x128xf32>
      %c0_27 = arith.constant 0 : index
      %c0_28 = arith.constant 0 : index
      %40 = vector.load %arg11[%c0_27, %c0_28] : memref<8x128xf32, #tpu.memory_space<vmem>>, vector<8x128xf32>
      tpu.vector_store %arg11[%c0_27, %c0_28], %39 {strides = array<i32>} : memref<8x128xf32, #tpu.memory_space<vmem>>, vector<8x128xf32>,
      %cst_29 = arith.constant 0.000000e+00 : f32
      %41 = vector.broadcast %cst_29 : f32 to vector<8x128xf32>
      %42 = arith.maximumf %31, %41 : vector<8x128xf32>
      %43 = arith.truncf %42 : vector<8x128xf32> to vector<8x128xbf16>
      %c0_30 = arith.constant 0 : index
      %c0_31 = arith.constant 0 : index
      %44 = vector.load %arg9[%c0_30, %c0_31] : memref<128x128xbf16, #tpu.memory_space<vmem>>, vector<128x128xbf16>
      %cst_32 = arith.constant dense<0.000000e+00> : vector<8x128xf32>
      %45 = tpu.matmul %43, %44, %cst_32 {dimension_numbers = #tpu.dot_dimension_numbers<[1], [0], [0], [1], [0, 0, 1, 1], [], []>} : vector<8x128xbf16>, vector<128x128xbf16>, vector<8x128xf32> -> vector<8x128xf32>
      %c0_33 = arith.constant 0 : index
      %c0_34 = arith.constant 0 : index
      %46 = vector.load %arg10[%c0_33, %c0_34] : memref<1x128xf32, #tpu.memory_space<vmem>>, vector<1x128xf32>
      %47 = vector.broadcast %46 : vector<1x128xf32> to vector<8x128xf32>
      %48 = arith.addf %45, %47 : vector<8x128xf32>
      %cst_35 = arith.constant dense<0xFF800000> : vector<8xf32>
      %49 = vector.multi_reduction <maximumf>, %48, %cst_35 [1] : vector<8x128xf32> to vector<8xf32>
      %50 = vector.shape_cast %49 : vector<8xf32> to vector<8x1xf32>
      %51 = vector.broadcast %50 : vector<8x1xf32> to vector<8x128xf32>
      %52 = arith.subf %48, %51 : vector<8x128xf32>
      %53 = math.exp %52 : vector<8x128xf32>
      %cst_36 = arith.constant dense<0.000000e+00> : vector<8xf32>
      %54 = vector.multi_reduction <add>, %53, %cst_36 [1] : vector<8x128xf32> to vector<8xf32>
      %55 = vector.shape_cast %54 : vector<8xf32> to vector<8x1xf32>
      %56 = tpu.reciprocal %55 {approx = true} : vector<8x1xf32> -> vector<8x1xf32>
      %57 = vector.broadcast %56 : vector<8x1xf32> to vector<8x128xf32>
      %58 = arith.mulf %53, %57 : vector<8x128xf32>
      %c0_37 = arith.constant 0 : index
      %c0_38 = arith.constant 0 : index
      %59 = vector.load %arg12[%c0_37, %c0_38] : memref<8x128xf32, #tpu.memory_space<vmem>>, vector<8x128xf32>
      tpu.vector_store %arg12[%c0_37, %c0_38], %58 {strides = array<i32>} : memref<8x128xf32, #tpu.memory_space<vmem>>, vector<8x128xf32>,
    } else {
    }
    return
  }
  func.func @transform_0(%arg0: i32, %arg1: i32) -> (i32, i32) {
    %c0_i32 = arith.constant 0 : i32
    return %arg0, %arg1 : i32, i32
  }
  func.func @transform_1(%arg0: i32, %arg1: i32) -> (i32, i32) {
    %c0_i32 = arith.constant 0 : i32
    %c0_i32_0 = arith.constant 0 : i32
    return %arg1, %c0_i32 : i32, i32
  }
  func.func @transform_2(%arg0: i32, %arg1: i32) -> (i32, i32) {
    %c0_i32 = arith.constant 0 : i32
    %c0_i32_0 = arith.constant 0 : i32
    %c0_i32_1 = arith.constant 0 : i32
    return %c0_i32, %c0_i32_0 : i32, i32
  }
  func.func @transform_3(%arg0: i32, %arg1: i32) -> (i32, i32) {
    %c0_i32 = arith.constant 0 : i32
    %c0_i32_0 = arith.constant 0 : i32
    %c0_i32_1 = arith.constant 0 : i32
    return %c0_i32, %c0_i32_0 : i32, i32
  }
  func.func @transform_4(%arg0: i32, %arg1: i32) -> (i32, i32) {
    %c0_i32 = arith.constant 0 : i32
    %c0_i32_0 = arith.constant 0 : i32
    %c0_i32_1 = arith.constant 0 : i32
    return %c0_i32, %c0_i32_0 : i32, i32
  }
  func.func @transform_5(%arg0: i32, %arg1: i32) -> (i32, i32) {
    %c0_i32 = arith.constant 0 : i32
    %c0_i32_0 = arith.constant 0 : i32
    %c0_i32_1 = arith.constant 0 : i32
    return %c0_i32, %c0_i32_0 : i32, i32
  }
  func.func @transform_6(%arg0: i32, %arg1: i32) -> (i32, i32) {
    %c0_i32 = arith.constant 0 : i32
    %c0_i32_0 = arith.constant 0 : i32
    %c0_i32_1 = arith.constant 0 : i32
    return %c0_i32, %c0_i32_0 : i32, i32
  }
  func.func @transform_7(%arg0: i32, %arg1: i32) -> (i32, i32) {
    %c0_i32 = arith.constant 0 : i32
    %c0_i32_0 = arith.constant 0 : i32
    %c0_i32_1 = arith.constant 0 : i32
    return %c0_i32, %c0_i32_0 : i32, i32
  }
  func.func @transform_8(%arg0: i32, %arg1: i32) -> (i32, i32) {
    %c0_i32 = arith.constant 0 : i32
    %c0_i32_0 = arith.constant 0 : i32
    %c0_i32_1 = arith.constant 0 : i32
    return %c0_i32, %c0_i32_0 : i32, i32
  }
  func.func @transform_9(%arg0: i32, %arg1: i32) -> (i32, i32) {
    %c0_i32 = arith.constant 0 : i32
    %c0_i32_0 = arith.constant 0 : i32
    return %arg0, %c0_i32 : i32, i32
  }
  func.func @transform_10(%arg0: i32, %arg1: i32) -> (i32, i32) {
    %c0_i32 = arith.constant 0 : i32
    %c0_i32_0 = arith.constant 0 : i32
    return %arg0, %c0_i32 : i32, i32
  }
}

</mosaic_0001>

<bundles_post_ra>
// kernel: tpu_custom_call.1
= control target key start
LH: loop header
LB: loop body
LE: loop exit
PB: predicated region body
PF: predicated region fallthrough
CT: control target
= control target key end

     0   :  { %s2245_s0 = inlined_call_operand.hbm [shape: bf16[8,1024], index: 0, kind: input, shape index: {}]   ;;  %s2246_s1 = inlined_call_operand.hbm [shape: bf16[1024,128], index: 1, kind: input, shape index: {}]   ;;  %s2247_s2 = inlined_call_operand.vmem [shape: f32[1,128], index: 2, kind: input, shape index: {}]   ;;  %s2248_s3 = inlined_call_operand.hbm [shape: bf16[128,128], index: 3, kind: input, shape index: {}]   ;;  %s2249_s4 = inlined_call_operand.vmem [shape: f32[1,128], index: 4, kind: input, shape index: {}]   ;;  %s2250_s5 = inlined_call_operand.hbm [shape: bf16[128,128], index: 5, kind: input, shape index: {}]   ;;  %s2251_s6 = inlined_call_operand.vmem [shape: f32[1,128], index: 6, kind: input, shape index: {}]   ;;  %s2252_s7 = inlined_call_operand.hbm [shape: bf16[128,128], index: 7, kind: input, shape index: {}]   ;;  %s2253_s8 = inlined_call_operand.vmem [shape: f32[1,128], index: 8, kind: input, shape index: {}]   ;;  %s2254_s9 = inlined_call_operand.hbm [shape: f32[8,128], index: 9, kind: output, shape index: {0}]   ;;  %s2255_s10 = inlined_call_operand.hbm [shape: f32[8,128], index: 10, kind: output, shape index: {1}]  }
   0x1   :  { %2260 = sst [smem:[#allocation24_spill]] %s2248_s3 }
   0x2   :  { %2261 = sst [smem:[#allocation25_spill]] %s2250_s5 }
   0x3   :  { %2262 = sst [smem:[#allocation26_spill]] %s2252_s7 }
   0x4   :  { %2263 = sst [smem:[#allocation27_spill]] %s2254_s9 }
   0x5   :  { %2264 = sst [smem:[#allocation28_spill]] %s2255_s10 }
   0x6   :  { %16 = vsyncpa [#allocation4], 0 }
   0x7   :  { %18 = vsyncpa [#allocation4 + $0x1], 0 }
   0x8   :  { %19 = vsyncpa [#allocation7], 0 }
   0x9   :  { %21 = vsyncpa [#allocation7 + $0x1], 0 }
   0xa   :  { %22 = vsyncpa [#allocation10], 0 }
   0xb   :  { %23 = vsyncpa [#allocation5], 0 }
   0xc   :  { %24 = vsyncpa [#allocation14], 0  ;;  %s2022_s13 = smov 0   ;;  %s2024_s14 = smov 0  }
   0xd   :  { %s2026_s15 = smov 0   ;;  %s2028_s16 = smov 0  }
   0xe   :  { %s2030_s17 = smov 0   ;;  %s2032_s18 = smov 0  }
   0xf LB: > { %2265 = sst [smem:[#allocation21_spill]] %s1945_s15  ;;  %s2053_s19 = sadd.s32 4294967295, %s1957_s18   ;;  %s1957_s18 = sphi %s2032_s18, %s30_s18   ;;  %s1953_s17 = sphi %s2030_s17, %s2286_s17   ;;  %s1949_s16 = sphi %s2028_s16, %s2285_s16   ;;  %s1945_s15 = sphi %s2026_s15, %s2284_s15   ;;  %s1941_s14 = sphi %s2024_s14, %s2283_s14   ;;  %s1937_s13 = sphi %s2022_s13, %s2282_s13  }
  0x10   : > { %p1256_p0 = scmp.ge.s32.totalorder %s1957_s18, 1  ;;  %p65_p1 = scmp.eq.s32.totalorder %s2053_s19, 0 }
  0x11   : > { %p300_p2 = scmp.lt.s32.totalorder %s1957_s18, 3  ;;  %s2266_s3 = sld [smem:[#allocation24_spill]] }
  0x12   : > { %s1959_s24 = smov [#allocation8]   ;;  %s2269_s5 = sld [smem:[#allocation25_spill]] }
  0x13   : > { %p2061_p3 = pnand %p1256_p0, %p300_p2  ;;  %s316_s25 = sshll.u32 %s1959_s24, 4  ;;  %s317_s25 = int_to_ptr.vmem [resolvable:$true] %s316_s25 }
  0x14   : > { %s2256_s30 = smov 64   ;;  %s2257_s11 = smov 4  }
  0x15   : > { %p1587_p4 = pneg %p2061_p3  ;;  %s1962_s12 = smov [#allocation9]  }
  0x16   : > { %s333_s20 = sshll.u32 %s1962_s12, 4  ;;  %s2270_s7 = sld [smem:[#allocation26_spill]]  ;;  %s334_s20 = int_to_ptr.vmem [resolvable:$true] %s333_s20 }
  0x17   : > { %s314_s22 = sshll.u32 %s2266_s3, 4  ;;  %p2069_p5 = pnand %p1587_p4, %p65_p1  ;;  %s315_s22 = int_to_ptr.hbm [resolvable:$true] %s314_s22 }
  0x18   : > { %s331_s29 = sshll.u32 %s2269_s5, 4  ;;  %s1963_s28 = smov [#allocation11]   ;;  %s332_s29 = int_to_ptr.hbm [resolvable:$true] %s331_s29 }
  0x19   : > { %1590 = dma.hbm_to_vmem [thread:$0]  (!%p2069_p5), %s315_s22, 1024, %s317_s25, [#allocation7], %s2256_s30, %s2256_s30, %s2257_s11  }
  0x1a   : > { %1593 = dma.hbm_to_vmem [thread:$0]  (!%p2069_p5), %s332_s29, 1024, %s334_s20, [#allocation10], %s2256_s30, %s2256_s30, %s2257_s11  }
  0x1b   : > { %s350_s22 = sshll.u32 %s1963_s28, 4  ;;  %s39_s25 = sadd.s32 1, %s1953_s17  ;;  %s351_s22 = int_to_ptr.vmem [resolvable:$true] %s350_s22 }
  0x1c   : > { %s348_s27 = sshll.u32 %s2270_s7, 4  ;;  %p40_p6 = scmp.ge.s32.totalorder %s39_s25, 2  ;;  %s349_s27 = int_to_ptr.hbm [resolvable:$true] %s348_s27 }
  0x1d   : > { %1596 = dma.hbm_to_vmem [thread:$0]  (!%p2069_p5), %s349_s27, 1024, %s351_s22, [#allocation10], %s2256_s30, %s2256_s30, %s2257_s11  }
  0x1e   : > { %s51_s12 = sadd.s32 1, %s1945_s15  ;;  %p58_p7 = scmp.ne.s32.totalorder %s1945_s15, %s1941_s14 }
  0x1f   : > { %p59_p8 = scmp.eq.s32.totalorder %s1957_s18, 0  ;;  %s2288_s25 = smov (%p40_p6, %s39_s25), 0 }
  0x20   : > { %2271 = sst [smem:[#allocation22_spill]] %s2288_s25  ;;  %p64_p10 = scmp.ne.s32.totalorder %s1941_s14, %s1937_s13 }
  0x21   : > { %p2101_p9 = por %p59_p8, %p58_p7  ;;  %s47_s26 = ssub.s32 %s1953_s17, %s2288_s25 }
  0x22   : > { %p1607_p11 = scmp.lt.s32.totalorder %s1957_s18, 2  ;;  %p49_p12 = scmp.eq.s32.totalorder %s47_s26, 0 }
  0x23   : > { %p2112_p13 = por %p65_p1, %p64_p10  ;;  %s367_s21 = sand.u32 1, %s1945_s15  }
  0x24   : > { %s1505_s24 = sshll.u32 %s1953_s17, 4  ;;  %s1261_s28 = sshll.u32 %s367_s21, 4 }
  0x25   : > { %s2119_s27 = scalar_select %p49_p12, %s1945_s15, %s51_s12  }
  0x26   : > { %s378_s11 = scalar_lea.hbm %s2245_s0, %s1505_s24  ;;  %s371_s3 = scalar_lea.vmem [#allocation3], %s1261_s28 }
  0x27   : > { %2274 = sst [smem:[#allocation23_spill]] %s2119_s27  ;;  %s380_s13 = sshll.u32 %s378_s11, 4  ;;  %s381_s13 = int_to_ptr.hbm [resolvable:$true] %s380_s13 }
  0x28   : > { %s382_s5 = sshll.u32 %s371_s3, 4  ;;  %p1598_p0 = pnand %p1607_p11, %p2101_p9  ;;  %s383_s5 = int_to_ptr.vmem [resolvable:$true] %s382_s5 }
  0x29   : > { %s1264_s26 = sshll.u32 %s367_s21, 8  ;;  %s1506_s7 = sshll.u32 %s1953_s17, 8 }
  0x2a   : > { %s393_s25 = scalar_lea.vmem [#allocation6], %s1264_s26  ;;  %s368_s12 = scalar_lea.sflag [#allocation4], %s367_s21 }
  0x2b   : > { %s401_s10 = sshll.u32 %s393_s25, 4  ;;  %s389_s27 = sand.u32 1, %s1957_s18   ;;  %s402_s10 = int_to_ptr.vmem [resolvable:$true] %s401_s10 }
  0x2c   : > { %1600 = dma.hbm_to_vmem [thread:$0]  (!%p1598_p0), %s381_s13, 256, %s383_s5, %s368_s12  }
  0x2d   : > { %s398_s30 = scalar_lea.hbm %s2246_s1, %s1506_s7  ;;  %s390_s3 = scalar_lea.sflag [#allocation7], %s389_s27 }
  0x2e   : > { %s399_s11 = sshll.u32 %s398_s30, 4  ;;  %s2275_s24 = smov 4   ;;  %s400_s11 = int_to_ptr.hbm [resolvable:$true] %s399_s11 }
  0x2f   : > { %s2276_s28 = smov 64   ;;  %413 = sbr.rel (%p2061_p3) target bundleno = 942 (0x3ae), region = 56 }
  0x30   : > { %1603 = dma.hbm_to_vmem [thread:$0]  (!%p1598_p0), %s400_s11, 4096, %s402_s10, %s390_s3, %s2276_s28, %s2276_s28, %s2275_s24  }
  0x31   : > { %s415_s25 = sand.u32 (!%p2061_p3), 1, %s1941_s14  }
  0x32   : > { %s1268_s5 = sshll.u32 (!%p2061_p3), %s415_s25, 4  ;;  %s416_s29 = scalar_lea.sflag (!%p2061_p3), [#allocation4], %s415_s25 }
  0x33   : > { %s2139_s21 = scalar_lea.vmem (!%p2061_p3), [#allocation3], %s1268_s5 }
  0x34   : > { %1912 = dma.done.wait (%p2112_p13), %s416_s29, 256  }
  0x35   : > { %1914 = vsyncadd (%p2112_p13), %s416_s29, 4294967040  ;;  %s425_s7 = sand.u32 1, %s2053_s19   ;;  %s1269_s9 = sshll.u32 %s415_s25, 8 }
  0x36   : > { %s426_s10 = scalar_lea.sflag [#allocation7], %s425_s7  ;;  %s2146_s15 = scalar_lea.vmem [#allocation6], %s1269_s9 }
  0x37   : > { %1916 = dma.done.wait (%p2112_p13), %s426_s10, 4096  }
  0x38   : > { %1918 = vsyncadd (%p2112_p13), %s426_s10, 4294963200 }
  0x39   : > { %1920 = dma.done.wait (%p65_p1), [#allocation7], 1024  }
  0x3a   : > { %1922 = vsyncadd (%p65_p1), [#allocation7], 4294966272 }
  0x3b   : > { %1924 = dma.done.wait (%p65_p1), [#allocation10], 2048  }
  0x3c   : > { %1926 = vsyncadd (%p65_p1), [#allocation10], 4294965248  ;;  %p1273_p2 = scmp.ne.s32.totalorder %s1949_s16, 0 }
  0x3e   : > { %487 = sbr.rel (%p1273_p2) target bundleno = 69 (0x45), region = 80 }
  0x43   : > { %v1964_v0 = vmov 0.0  }
  0x44   : > { %488 = vst [vmem:[#allocation2] sm:$0xff] %v1964_v0 }
  0x45 PF: > { %v1514_v1 = vld [vmem:[%s2146_s15 + $0x38] sm:$0xff]  ;;  %v1513_v5 = vld [vmem:[%s2146_s15 + $0x30] sm:$0xff]  ;;  %v1512_v9 = vld [vmem:[%s2146_s15 + $0x28] sm:$0xff]  ;;  %p1402_p1 = scmp.ne.s32.totalorder %s1949_s16, 1 }
  0x46   : > { %v1522_v2 = vld [vmem:[%s2146_s15 + $0x78] sm:$0xff]  ;;  %762 = vmatpush.bf16.msra.mxu0 %v1514_v1  ;;  %v1521_v6 = vld [vmem:[%s2146_s15 + $0x70] sm:$0xff]  ;;  %v1520_v10 = vld [vmem:[%s2146_s15 + $0x68] sm:$0xff] }
  0x47   : > { %v1530_v3 = vld [vmem:[%s2146_s15 + $0xb8] sm:$0xff]  ;;  %775 = vmatpush.bf16.msra.mxu1 %v1522_v2  ;;  %v1529_v7 = vld [vmem:[%s2146_s15 + $0xb0] sm:$0xff]  ;;  %v1528_v11 = vld [vmem:[%s2146_s15 + $0xa8] sm:$0xff] }
  0x48   : > { %v1538_v4 = vld [vmem:[%s2146_s15 + $0xf8] sm:$0xff]  ;;  %788 = vmatpush.bf16.msra.mxu2 %v1530_v3  ;;  %v1537_v8 = vld [vmem:[%s2146_s15 + $0xf0] sm:$0xff]  ;;  %v1536_v12 = vld [vmem:[%s2146_s15 + $0xe8] sm:$0xff] }
  0x49   : > { %801 = vmatpush.bf16.msra.mxu3 %v1538_v4  ;;  %v1511_v13 = vld [vmem:[%s2146_s15 + $0x20] sm:$0xff]  ;;  %v1510_v17 = vld [vmem:[%s2146_s15 + $0x18] sm:$0xff]  ;;  %v1509_v21 = vld [vmem:[%s2146_s15 + $0x10] sm:$0xff] }
  0x4a   : > { %763 = vmatpush.bf16.msra.mxu0 %v1513_v5  ;;  %v1519_v14 = vld [vmem:[%s2146_s15 + $0x60] sm:$0xff]  ;;  %v1518_v18 = vld [vmem:[%s2146_s15 + $0x58] sm:$0xff]  ;;  %v1517_v22 = vld [vmem:[%s2146_s15 + $0x50] sm:$0xff] }
  0x4b   : > { %776 = vmatpush.bf16.msra.mxu1 %v1521_v6  ;;  %v1527_v15 = vld [vmem:[%s2146_s15 + $0xa0] sm:$0xff]  ;;  %v1526_v19 = vld [vmem:[%s2146_s15 + $0x98] sm:$0xff]  ;;  %v1525_v23 = vld [vmem:[%s2146_s15 + $0x90] sm:$0xff] }
  0x4c   : > { %789 = vmatpush.bf16.msra.mxu2 %v1529_v7  ;;  %v1535_v16 = vld [vmem:[%s2146_s15 + $0xe0] sm:$0xff]  ;;  %v1534_v20 = vld [vmem:[%s2146_s15 + $0xd8] sm:$0xff]  ;;  %v1533_v24 = vld [vmem:[%s2146_s15 + $0xd0] sm:$0xff] }
  0x4d   : > { %802 = vmatpush.bf16.msra.mxu3 %v1537_v8  ;;  %v1508_v25 = vld [vmem:[%s2146_s15 + $0x8] sm:$0xff]  ;;  %v490_v27 = vld [vmem:[%s2139_s21] sm:$0xff]  ;;  %v489_v51 = vld [vmem:[#allocation2] sm:$0xff] }
  0x4e   : > { %764 = vmatpush.bf16.msra.mxu0 %v1512_v9  ;;  %v1516_v26 = vld [vmem:[%s2146_s15 + $0x48] sm:$0xff]  ;;  %v558_v31 = vunpack.c.l.b16 %v490_v27  ;;  %v559_v32 = vunpack.c.h.b16 %v490_v27  ;;  %v1507_v33 = vld [vmem:[%s2146_s15] sm:$0xff] }
  0x4f   : > { %777 = vmatpush.bf16.msra.mxu1 %v1520_v10  ;;  %v1524_v28 = vld [vmem:[%s2146_s15 + $0x88] sm:$0xff]  ;;  %v1515_v34 = vld [vmem:[%s2146_s15 + $0x40] sm:$0xff] }
  0x50   : > { %790 = vmatpush.bf16.msra.mxu2 %v1528_v11  ;;  %v1532_v29 = vld [vmem:[%s2146_s15 + $0xc8] sm:$0xff]  ;;  %v1523_v37 = vld [vmem:[%s2146_s15 + $0x80] sm:$0xff]  ;;  %v562_v39 = vpack.c.b16 %v558_v31, %v558_v31  ;;  %v563_v40 = vpack.c.b16 %v559_v32, %v559_v32 }
  0x51   : > { %803 = vmatpush.bf16.msra.mxu3 %v1536_v12  ;;  %v491_v30 = vld [vmem:[%s2139_s21 + $0x8] sm:$0xff]  ;;  %v1531_v38 = vld [vmem:[%s2146_s15 + $0xc0] sm:$0xff] }
  0x52   : > { %765 = vmatpush.bf16.msra.mxu0 %v1511_v13  ;;  %v560_v35 = vunpack.c.l.b16 %v491_v30  ;;  %v561_v36 = vunpack.c.h.b16 %v491_v30 }
  0x53   : > { %778 = vmatpush.bf16.msra.mxu1 %v1519_v14 }
  0x54   : > { %791 = vmatpush.bf16.msra.mxu2 %v1527_v15  ;;  %v564_v41 = vpack.c.b16 %v560_v35, %v560_v35  ;;  %v565_v42 = vpack.c.b16 %v561_v36, %v561_v36 }
  0x55   : > { %804 = vmatpush.bf16.msra.mxu3 %v1535_v16 }
  0x56   : > { %766 = vmatpush.bf16.msra.mxu0 %v1510_v17 }
  0x57   : > { %779 = vmatpush.bf16.msra.mxu1 %v1518_v18 }
  0x58   : > { %792 = vmatpush.bf16.msra.mxu2 %v1526_v19 }
  0x59   : > { %805 = vmatpush.bf16.msra.mxu3 %v1534_v20 }
  0x5a   : > { %767 = vmatpush.bf16.msra.mxu0 %v1509_v21 }
  0x5b   : > { %780 = vmatpush.bf16.msra.mxu1 %v1517_v22 }
  0x5c   : > { %793 = vmatpush.bf16.msra.mxu2 %v1525_v23 }
  0x5d   : > { %806 = vmatpush.bf16.msra.mxu3 %v1533_v24 }
  0x5e   : > { %768 = vmatpush.bf16.msra.mxu0 %v1508_v25 }
  0x5f   : > { %781 = vmatpush.bf16.msra.mxu1 %v1516_v26 }
  0x60   : > { %794 = vmatpush.bf16.msra.mxu2 %v1524_v28 }
  0x61   : > { %807 = vmatpush.bf16.msra.mxu3 %v1532_v29 }
  0x62   : > { %769 = vmatpush.bf16.msra.mxu0 %v1507_v33 }
  0x63   : > { %782 = vmatpush.bf16.msra.mxu1 %v1515_v34 }
  0x64   : > { %795 = vmatpush.bf16.msra.mxu2 %v1523_v37 }
  0x65   : > { %808 = vmatpush.bf16.msra.mxu3 %v1531_v38  ;;  %770 = vmatmul.bf16.vlgmr.msra.gmra.mxu0 %v562_v39 }
  0x66   : > { %783 = vmatmul.bf16.vlgmr.msra.gmra.mxu1 %v563_v40 }
  0x67   : > { %796 = vmatmul.bf16.vlgmr.msra.gmra.mxu2 %v564_v41 }
  0x68   : > { %809 = vmatmul.bf16.vlgmr.msra.gmra.mxu3 %v565_v42 }
  0xe2   : > { %v771_v43 = vpop.f32.mrf.mxu0 }
  0xe3   : > { %v784_v44 = vpop.f32.mrf.mxu1 }
  0xe4   : > { %v785_v45 = vadd.f32 %v784_v44, %v771_v43 }
  0xea   : > { %v797_v46 = vpop.f32.mrf.mxu2  ;;  %v773_v49 = vpop.f32.mrf.mxu0 }
  0xeb   : > { %v810_v47 = vpop.f32.mrf.mxu3  ;;  %v798_v48 = vadd.f32 %v797_v46, %v785_v45  ;;  %v786_v50 = vpop.f32.mrf.mxu1 }
  0xed   : > { %v811_v52 = vadd.f32 %v810_v47, %v798_v48 }
  0xef   : > { %v814_v53 = vadd.f32 %v811_v52, %v489_v51  ;;  %819 = sbr.rel (%p1402_p1) target bundleno = 927 (0x39f), region = 84 }
  0xf1   : > { %815 = vst [vmem:[#allocation2] sm:$0xff] %v814_v53 }
  0xf2   : > { %v799_v54 = vpop.f32.mrf.mxu2 }
  0xf3   : > { %v812_v55 = vpop.f32.mrf.mxu3 }
  0xf4   : > { %v1546_v56 = vld [vmem:[#allocation8 + $0x38] sm:$0xff]  ;;  %v1545_v57 = vld [vmem:[#allocation8 + $0x30] sm:$0xff]  ;;  %v1544_v60 = vld [vmem:[#allocation8 + $0x28] sm:$0xff] }
  0xf5   : > { %896 = vmatpush.bf16.msra.mxu0 %v1546_v56  ;;  %v1554_v58 = vld [vmem:[#allocation9 + $0x38] sm:$0xff]  ;;  %v1553_v59 = vld [vmem:[#allocation9 + $0x30] sm:$0xff]  ;;  %v1552_v61 = vld [vmem:[#allocation9 + $0x28] sm:$0xff] }
  0xf6   : > { %979 = vmatpush.bf16.msra.mxu1 %v1554_v58  ;;  %v1543_v62 = vld [vmem:[#allocation8 + $0x20] sm:$0xff]  ;;  %v1542_v0 = vld [vmem:[#allocation8 + $0x18] sm:$0xff]  ;;  %v1541_v3 = vld [vmem:[#allocation8 + $0x10] sm:$0xff] }
  0xf7   : > { %v1551_v63 = vld [vmem:[#allocation9 + $0x20] sm:$0xff]  ;;  %v1671_v1 = vld [vmem:[%s2247_s2] ss:$0 sm:$0xff]  ;;  %v1549_v6 = vld [vmem:[#allocation9 + $0x10] sm:$0xff] }
  0xf8   : > { %v1550_v2 = vld [vmem:[#allocation9 + $0x18] sm:$0xff]  ;;  %v1540_v7 = vld [vmem:[#allocation8 + $0x8] sm:$0xff]  ;;  %v1539_v9 = vld [vmem:[#allocation8] sm:$0xff] }
  0xf9   : > { %897 = vmatpush.bf16.msra.mxu0 %v1545_v57  ;;  %v820_v4 = vld [vmem:[#allocation2] sm:$0xff]  ;;  %v1548_v11 = vld [vmem:[#allocation9 + $0x8] sm:$0xff]  ;;  %v1547_v12 = vld [vmem:[#allocation9] sm:$0xff] }
  0xfa   : > { %980 = vmatpush.bf16.msra.mxu1 %v1553_v59  ;;  %v825_v5 = vadd.f32 %v1671_v1, %v820_v4  ;;  %v1562_v13 = vld [vmem:[#allocation11 + $0x38] sm:$0xff]  ;;  %v1561_v14 = vld [vmem:[#allocation11 + $0x30] sm:$0xff]  ;;  %v1560_v15 = vld [vmem:[#allocation11 + $0x28] sm:$0xff] }
  0xfb   : > { %1078 = vmatpush.bf16.msra.mxu2 %v1562_v13  ;;  %v1559_v16 = vld [vmem:[#allocation11 + $0x20] sm:$0xff]  ;;  %v1558_v17 = vld [vmem:[#allocation11 + $0x18] sm:$0xff]  ;;  %v1557_v18 = vld [vmem:[#allocation11 + $0x10] sm:$0xff] }
  0xfc   : > { %v826_v8 = vmax.f32 %v825_v5, 0.0  ;;  %v1672_v19 = vld [vmem:[%s2249_s4] ss:$0 sm:$0xff]  ;;  %v1556_v25 = vld [vmem:[#allocation11 + $0x8] sm:$0xff]  ;;  %v1555_v26 = vld [vmem:[#allocation11] sm:$0xff] }
  0xfd   : > { %898 = vmatpush.bf16.msra.mxu0 %v1544_v60  ;;  %v1673_v27 = vld [vmem:[%s2251_s6] ss:$0 sm:$0xff] }
  0xfe   : > { %981 = vmatpush.bf16.msra.mxu1 %v1552_v61  ;;  %v827_v10 = vpack.c.bf16 %v826_v8, %v826_v8  ;;  %v1674_v33 = vld [vmem:[%s2253_s8] ss:$0 sm:$0xff] }
  0xff   : > { %1079 = vmatpush.bf16.msra.mxu2 %v1561_v14 }
 0x101   : > { %899 = vmatpush.bf16.msra.mxu0 %v1543_v62 }
 0x102   : > { %982 = vmatpush.bf16.msra.mxu1 %v1551_v63 }
 0x103   : > { %1080 = vmatpush.bf16.msra.mxu2 %v1560_v15 }
 0x105   : > { %900 = vmatpush.bf16.msra.mxu0 %v1542_v0 }
 0x106   : > { %983 = vmatpush.bf16.msra.mxu1 %v1550_v2 }
 0x107   : > { %1081 = vmatpush.bf16.msra.mxu2 %v1559_v16 }
 0x109   : > { %901 = vmatpush.bf16.msra.mxu0 %v1541_v3 }
 0x10a   : > { %984 = vmatpush.bf16.msra.mxu1 %v1549_v6 }
 0x10b   : > { %1082 = vmatpush.bf16.msra.mxu2 %v1558_v17 }
 0x10d   : > { %902 = vmatpush.bf16.msra.mxu0 %v1540_v7 }
 0x10e   : > { %985 = vmatpush.bf16.msra.mxu1 %v1548_v11 }
 0x10f   : > { %1083 = vmatpush.bf16.msra.mxu2 %v1557_v18 }
 0x111   : > { %903 = vmatpush.bf16.msra.mxu0 %v1539_v9 }
 0x112   : > { %986 = vmatpush.bf16.msra.mxu1 %v1547_v12 }
 0x113   : > { %1084 = vmatpush.bf16.msra.mxu2 %v1556_v25 }
 0x114   : > { %904 = vmatmul.bf16.vlgmr.msra.gmra.mxu0 %v827_v10 }
 0x117   : > { %1085 = vmatpush.bf16.msra.mxu2 %v1555_v26 }
 0x191   : > { %v905_v20 = vpop.f32.mrf.mxu0 }
 0x192   : > { %v906_v21 = vadd.f32 %v1672_v19, %v905_v20 }
 0x194   : > { %v909_v22 = vmax.f32 %v906_v21, 0.0 }
 0x196   : > { %v910_v23 = vpack.c.bf16 %v909_v22, %v909_v22 }
 0x198   : > { %987 = vmatmul.bf16.vlgmr.msra.gmra.mxu1 %v910_v23 }
 0x199   : > { %v907_v24 = vpop.f32.mrf.mxu0 }
 0x215   : > { %v988_v28 = vpop.f32.mrf.mxu1 }
 0x216   : > { %v989_v29 = vadd.f32 %v1673_v27, %v988_v28 }
 0x218   : > { %v1008_v30 = vmax.f32 %v989_v29, 0.0  ;;  %v992_v37 = vmul.f32 %v989_v29, %v989_v29 }
 0x21a   : > { %v1009_v31 = vpack.c.bf16 %v1008_v30, %v1008_v30 }
 0x21c   : > { %1086 = vmatmul.bf16.vlgmr.msra.gmra.mxu2 %v1009_v31 }
 0x21d   : > { %v990_v32 = vpop.f32.mrf.mxu1 }
 0x29f   : > { %v1087_v34 = vpop.f32.mrf.mxu2 }
 0x2a0   : > { %v1088_v35 = vadd.f32 %v1674_v33, %v1087_v34 }
 0x2a2   : > { %1091 = vmax.xlane.f32.xlu0 %v1088_v35 }
 0x2a7   : > { %v1089_v36 = vpop.f32.mrf.mxu2 }
 0x2aa   : > { %993 = vadd.xlane.f32.xlu0 %v992_v37 }
 0x315   : > { %v1092_v38 = vpop.xlane.xlu0 %1091 }
 0x316   : > { %v1093_v39 = vsub.f32 %v1088_v35, %v1092_v38 }
 0x318   : > { %v1094_v40 = vmul.f32 1.442695, %v1093_v39 }
 0x31a   : > { %1675 = vpow2.f32 %v1094_v40 }
 0x31d   : > { %v994_v41 = vpop.xlane.xlu0 %993 }
 0x31e   : > { %v995_v42 = vmax.f32 %v994_v41, 1e-24 }
 0x320   : > { %v1676_v43 = vpop.eup %1675  ;;  %1677 = vrsqrt.f32 %v995_v42  ;;  %vm1002_vm1 = vweird.f32 %v995_v42 }
 0x321   : > { %1096 = vadd.xlane.f32.xlu1 %v1676_v43 }
 0x326   : > { %v1678_v44 = vpop.eup %1677 }
 0x327   : > { %v997_v45 = vmul.f32 %v1678_v44, %v995_v42  ;;  %vm1003_vm0 = vweird.f32 %v1678_v44 }
 0x328   : > { %vm1004_vm2 = vmor %vm1002_vm1, %vm1003_vm0 }
 0x329   : > { %v998_v46 = vmul.f32 %v1678_v44, %v997_v45 }
 0x32b   : > { %v999_v47 = vmul.f32 0.5, %v998_v46 }
 0x32d   : > { %v1000_v48 = vsub.f32 1.5, %v999_v47 }
 0x32f   : > { %v1001_v49 = vmul.f32 %v1678_v44, %v1000_v48 }
 0x331   : > { %v1005_v50 = vsel %vm1004_vm2, %v1678_v44, %v1001_v49 }
 0x332   : > { %v1006_v51 = vmul.f32 %v1005_v50, %v989_v29 }
 0x334   : > { %1007 = vst [vmem:[#allocation12] sm:$0xff] %v1006_v51 }
 0x394   : > { %v1097_v52 = vpop.xlane.xlu1 %1096 }
 0x395   : > { %1679 = vrcp.f32 %v1097_v52 }
 0x39b   : > { %v1680_v53 = vpop.eup %1679 }
 0x39c   : > { %v1099_v54 = vmul.f32 %v1680_v53, %v1676_v43 }
 0x39e   : > { %1100 = vst [vmem:[#allocation13] sm:$0xff] %v1099_v54 }
 0x39f PF: > { %p1611_p3 = scmp.eq.s32.totalorder %s2053_s19, 1  ;;  %s2277_s3 = sld [smem:[#allocation27_spill]] }
 0x3a0   : > { %s1965_s28 = smov [#allocation12]   ;;  %s1966_s5 = smov [#allocation13]  }
 0x3a1   : > { %s1109_s25 = sshll.u32 %s1965_s28, 4  ;;  %s1123_s29 = sshll.u32 %s1966_s5, 4  ;;  %s1110_s25 = int_to_ptr.vmem [resolvable:$true] %s1109_s25  ;;  %s1124_s29 = int_to_ptr.vmem [resolvable:$true] %s1123_s29 }
 0x3a2   : > { %s2278_s9 = sld [smem:[#allocation28_spill]] }
 0x3a5   : > { %s1111_s24 = sshll.u32 %s2277_s3, 4  ;;  %s1112_s24 = int_to_ptr.hbm [resolvable:$true] %s1111_s24 }
 0x3a6   : > { %1580 = dma.vmem_to_hbm [thread:$0]  (%p1611_p3), %s1110_s25, 128, %s1112_s24, [#allocation5]  }
 0x3a8   : > { %s1125_s10 = sshll.u32 %s2278_s9, 4  ;;  %s1126_s10 = int_to_ptr.hbm [resolvable:$true] %s1125_s10 }
 0x3a9   : > { %1582 = dma.vmem_to_hbm [thread:$0]  (%p1611_p3), %s1124_s29, 128, %s1126_s10, [#allocation14]  }
 0x3aa   : > { %1928 = dma.done.wait (%p1611_p3), [#allocation5], 128  }
 0x3ab   : > { %1930 = vsyncadd (%p1611_p3), [#allocation5], 4294967168 }
 0x3ac   : > { %1932 = dma.done.wait (%p1611_p3), [#allocation14], 128  }
 0x3ad   : > { %1934 = vsyncadd (%p1611_p3), [#allocation14], 4294967168 }
 0x3ae PF: > { %s30_s18 = sadd.s32 1, %s1957_s18   ;;  %s2279_s15 = sld [smem:[#allocation21_spill]] }
 0x3af   : > { %p27_p4 = scmp.ge.s32.totalorder %s30_s18, 4   ;;  %s2280_s23 = sld [smem:[#allocation23_spill]] }
 0x3b0   : > { %s2281_s20 = sld [smem:[#allocation22_spill]]  ;;  %s2282_s13 = smov %s1941_s14 }
 0x3b1   : > { %s2285_s16 = smov %s1953_s17 }
 0x3b2   :  { %29 = sbr.rel (!%p27_p4) target bundleno = 15 (0xf), region = 136 }
 0x3b4   : > { %s2283_s14 = smov %s2279_s15 }
 0x3b5   : > { %s2284_s15 = smov %s2280_s23 }
 0x3b6   : > { %s2286_s17 = smov %s2281_s20 }
 0x3b7   :  { %1144 = vsyncpa [#allocation4], 1 }
 0x3b8   :  { %1146 = vsyncpa [#allocation4 + $0x1], 1 }
 0x3b9   :  { %1147 = vsyncpa [#allocation7], 1 }
 0x3ba   :  { %1149 = vsyncpa [#allocation7 + $0x1], 1 }
 0x3bb   :  { %1150 = vsyncpa [#allocation10], 1 }
 0x3bc   :  { %1151 = vsyncpa [#allocation5], 1 }
 0x3bd   :  { %1153 = vsyncpa [#allocation5 + $0x1], 1 }
 0x3be   :  { %1154 = vsyncpa [#allocation14], 1 }

</bundles_post_ra>
